<compile_context>
chip_gen: v7x
topology: tpu7x:2x2x1
jax: 0.10.0
libtpu: 0.0.40
codegen_flags: <defaults>
</compile_context>

<pallas_src>
import functools

import jax
import jax.numpy as jnp
from jax.experimental import pallas as pl
from jax.experimental.pallas import tpu as pltpu


def _scse_kernel(x_ref, w1_ref, b1_ref, w2_ref, b2_ref, ws_ref, bs_ref, o_ref,
                 *, inv_hw):
    # x block: (nb, C, HWp), kept in its native dtype (no full-slab upcast).
    x = x_ref[...]
    nb, C, _ = x.shape

    # ---- cSE branch (tiny, f32): global average pool + two 1x1 convs, batched.
    # Padded lanes / padded images are zeros, so the f32-accumulating sum is exact;
    # divide by the true HW (inv_hw is a trace-time constant).
    pooled = jnp.sum(x, axis=2, dtype=jnp.float32) * inv_hw                 # (nb, C)
    h = jnp.einsum("nc,hc->nh", pooled, w1_ref[...],
                   preferred_element_type=jnp.float32) + b1_ref[...]        # (nb, hidden)
    h = jnp.maximum(h, 0.0)                                                 # ReLU
    cse = jax.nn.sigmoid(
        jnp.einsum("nh,ch->nc", h, w2_ref[...],
                   preferred_element_type=jnp.float32) + b2_ref[...])       # (nb, C)

    # ---- sSE branch: one batched (1,C)@(C,HWp) contraction on the idle MXU,
    # one sigmoid over (nb, 1, HWp).  (Hoisted out of any per-image loop.)
    ws_b = jnp.broadcast_to(ws_ref[...][None].astype(x.dtype), (nb, 1, C))  # tiny
    sp = jnp.einsum("nxc,nck->nxk", ws_b, x,
                    preferred_element_type=jnp.float32)                     # (nb, 1, HWp)
    sse = jax.nn.sigmoid(sp + bs_ref[0])                                    # (nb, 1, HWp)

    # ---- fold both gates before touching the big slab; apply in input dtype so the
    # only full-block VPU work is one broadcast-add and one multiply.
    gate = cse[:, :, None].astype(x.dtype) + sse.astype(x.dtype)            # (nb, C, HWp)
    o_ref[...] = (x * gate).astype(o_ref.dtype)


def _vmem_capacity_bytes():
    try:
        return int(pltpu.get_tpu_info().vmem_capacity_bytes)
    except Exception:
        return 64 * 2**20  # conservative (v7x-sized) fallback


def _pick_image_block(n_images, bytes_per_image, target_bytes, keep_two_steps):
    """Largest image block hitting ~target_bytes; optionally keep >=2 grid steps
    (only wanted on megacore / v7x-class chips)."""
    nb = max(1, min(n_images, int(target_bytes // max(1, bytes_per_image))))
    if keep_two_steps and n_images >= 2:
        nb = min(nb, -(-n_images // 2))  # ceil(N/2) guarantees >= 2 grid steps
    return nb


def scse_forward(x, params):
    """x: (N, C, H, W).  params in PyTorch conv shapes flattened to dense:
    w1 (hidden, C), b1 (hidden,), w2 (C, hidden), b2 (C,), ws (C,), bs ()."""
    w1, b1, w2, b2, ws, bs = params
    N, C, H, W = x.shape
    HW = H * W
    hidden = w1.shape[0]
    itemsize = jnp.dtype(x.dtype).itemsize

    # Lane-dense output: pad flattened spatial up to a multiple of 128.
    HWp = ((HW + 127) // 128) * 128

    vmem_cap = _vmem_capacity_bytes()
    small_vmem = vmem_cap <= 64 * 2**20            # v7x-class TensorCore
    target_block = (4 if small_vmem else 8) * 2**20
    bytes_per_image = C * HWp * itemsize
    nb = _pick_image_block(N, bytes_per_image, target_block,
                           keep_two_steps=small_vmem)

    grid_n = pl.cdiv(N, nb)
    Np = grid_n * nb

    # Wrapper-side layout plumbing (free reshape; zero-pad only when required).
    x3 = x.reshape(N, C, HW)
    if Np != N or HWp != HW:
        x3 = jnp.pad(x3, ((0, Np - N), (0, 0), (0, HWp - HW)))

    w1m = jnp.asarray(w1, jnp.float32)                   # (hidden, C)
    b1r = jnp.asarray(b1, jnp.float32).reshape(1, hidden)
    w2m = jnp.asarray(w2, jnp.float32)                   # (C, hidden)
    b2r = jnp.asarray(b2, jnp.float32).reshape(1, C)
    wsr = jnp.asarray(ws, jnp.float32).reshape(1, C)
    bss = jnp.asarray(bs, jnp.float32).reshape(1)        # scalar -> SMEM

    # VMEM budget: 2x double-buffered input + 2x output blocks + ~2 block temps.
    block_bytes = nb * C * HWp * itemsize
    need = 6 * block_bytes + 2 * 2**20
    cap = 48 * 2**20 if small_vmem else 96 * 2**20
    vmem_limit = int(min(cap, max(32 * 2**20, need)))

    cost = pl.CostEstimate(
        flops=int(2 * N * C * HW          # sSE 1x1 conv
                  + 4 * N * C * hidden    # two cSE matmuls
                  + 3 * N * C * HW),      # pool + gate add + gate mul
        transcendentals=int(N * (HW + C)),
        bytes_accessed=int(2 * N * C * HW * itemsize
                           + 4 * (2 * C * hidden + hidden + 2 * C + 1)),
    )

    kernel = functools.partial(_scse_kernel, inv_hw=1.0 / HW)

    out = pl.pallas_call(
        kernel,
        out_shape=jax.ShapeDtypeStruct((Np, C, HWp), x.dtype),
        grid_spec=pltpu.PrefetchScalarGridSpec(
            num_scalar_prefetch=0,
            grid=(grid_n,),
            in_specs=[
                pl.BlockSpec((nb, C, HWp), lambda i: (i, 0, 0)),        # x block
                pl.BlockSpec((hidden, C), lambda i: (0, 0)),            # cSE conv1 W
                pl.BlockSpec((1, hidden), lambda i: (0, 0)),            # cSE conv1 b
                pl.BlockSpec((C, hidden), lambda i: (0, 0)),            # cSE conv2 W
                pl.BlockSpec((1, C), lambda i: (0, 0)),                 # cSE conv2 b
                pl.BlockSpec((1, C), lambda i: (0, 0)),                 # sSE conv W
                pl.BlockSpec(memory_space=pltpu.MemorySpace.SMEM),      # sSE bias
            ],
            out_specs=pl.BlockSpec((nb, C, HWp), lambda i: (i, 0, 0)),
        ),
        compiler_params=pltpu.CompilerParams(
            dimension_semantics=("parallel",),
            vmem_limit_bytes=vmem_limit,
        ),
        cost_estimate=cost,
    )(x3, w1m, b1r, w2m, b2r, wsr, bss)

    if Np != N or HWp != HW:
        out = out[:N, :, :HW]
    return out.reshape(N, C, H, W)


def scse_reference(x, params):
    """Pure-JAX reference matching the PyTorch SCSEModule.forward."""
    w1, b1, w2, b2, ws, bs = params
    pooled = x.mean(axis=(2, 3))                               # (N, C)
    h = jnp.maximum(pooled @ w1.T + b1, 0.0)                   # (N, hidden)
    cse = jax.nn.sigmoid(h @ w2.T + b2)                        # (N, C)
    sp = jnp.einsum("nchw,c->nhw", x, ws) + bs                 # (N, H, W)
    sse = jax.nn.sigmoid(sp)[:, None, :, :]                    # (N, 1, H, W)
    return x * cse[:, :, None, None] + x * sse


def init_params(key, in_channels, reduction):
    hidden = in_channels // reduction
    k1, k2, k3, k4, k5, k6 = jax.random.split(key, 6)
    w1 = jax.random.normal(k1, (hidden, in_channels), jnp.float32) * 0.1
    b1 = jax.random.normal(k2, (hidden,), jnp.float32) * 0.1
    w2 = jax.random.normal(k3, (in_channels, hidden), jnp.float32) * 0.1
    b2 = jax.random.normal(k4, (in_channels,), jnp.float32) * 0.1
    ws = jax.random.normal(k5, (in_channels,), jnp.float32) * 0.1
    bs = jax.random.normal(k6, (), jnp.float32) * 0.1
    return (w1, b1, w2, b2, ws, bs)


if __name__ == "__main__":
    N, C, H, W = 2, 16, 16, 16
    reduction = 4   # hidden = 4

    key = jax.random.PRNGKey(0)
    kx, kp = jax.random.split(key)
    x = jax.random.normal(kx, (N, C, H, W), jnp.float32)
    params = init_params(kp, C, reduction)

    out = jax.block_until_ready(scse_forward(x, params))
    ref = scse_reference(x, params)

    assert out.shape == (N, C, H, W)
    assert jnp.allclose(out, ref, atol=2e-5, rtol=2e-5), "mismatch vs reference"

    print("KERNEL_OK")
</pallas_src>

<mosaic_0001>
module attributes {stable_mosaic.version = 11 : i64} {
  func.func @_scse_kernel(%arg0: i32, %arg1: memref<1x16x256xf32, #tpu.memory_space<vmem>>, %arg2: memref<4x16xf32, #tpu.memory_space<vmem>>, %arg3: memref<1x4xf32, #tpu.memory_space<vmem>>, %arg4: memref<16x4xf32, #tpu.memory_space<vmem>>, %arg5: memref<1x16xf32, #tpu.memory_space<vmem>>, %arg6: memref<1x16xf32, #tpu.memory_space<vmem>>, %arg7: memref<1xf32, #tpu.memory_space<smem>>, %arg8: memref<1x16x256xf32, #tpu.memory_space<vmem>>) attributes {dimension_semantics = [#tpu.dimension_semantics<parallel>], iteration_bounds = array<i64: 2>, scalar_prefetch = 0 : i64, scratch_operands = 0 : i64, tpu.core_type = #tpu.core_type<tc>, window_params = [{transform_indices = @transform_0, window_bounds = array<i64: 1, 16, 256>}, {pipeline_mode = #tpu.pipeline_mode<synchronous>, transform_indices = @transform_1, window_bounds = array<i64: 4, 16>}, {pipeline_mode = #tpu.pipeline_mode<synchronous>, transform_indices = @transform_2, window_bounds = array<i64: 1, 4>}, {pipeline_mode = #tpu.pipeline_mode<synchronous>, transform_indices = @transform_3, window_bounds = array<i64: 16, 4>}, {pipeline_mode = #tpu.pipeline_mode<synchronous>, transform_indices = @transform_4, window_bounds = array<i64: 1, 16>}, {pipeline_mode = #tpu.pipeline_mode<synchronous>, transform_indices = @transform_5, window_bounds = array<i64: 1, 16>}, {transform_indices = @transform_6, window_bounds = array<i64: 1>}, {transform_indices = @transform_7, window_bounds = array<i64: 1, 16, 256>}]} {
    %c0 = arith.constant 0 : index
    %c0_0 = arith.constant 0 : index
    %c0_1 = arith.constant 0 : index
    %0 = vector.load %arg1[%c0, %c0_0, %c0_1] : memref<1x16x256xf32, #tpu.memory_space<vmem>>, vector<1x16x256xf32>
    %cst = arith.constant dense<0.000000e+00> : vector<1x16xf32>
    %1 = vector.multi_reduction <add>, %0, %cst [2] : vector<1x16x256xf32> to vector<1x16xf32>
    %cst_2 = arith.constant 3.906250e-03 : f32
    %2 = vector.broadcast %cst_2 : f32 to vector<1x16xf32>
    %3 = arith.mulf %1, %2 : vector<1x16xf32>
    %c0_3 = arith.constant 0 : index
    %c0_4 = arith.constant 0 : index
    %4 = vector.load %arg2[%c0_3, %c0_4] : memref<4x16xf32, #tpu.memory_space<vmem>>, vector<4x16xf32>
    "tpu.trace_start"() <{level = 10 : i32, message = "nc,hc->nh"}> : () -> ()
    %cst_5 = arith.constant dense<0.000000e+00> : vector<1x4xf32>
    %5 = tpu.matmul %3, %4, %cst_5 {dimension_numbers = #tpu.dot_dimension_numbers<[1], [1], [0], [0], [0, 0, 1, 0], [], []>} : vector<1x16xf32>, vector<4x16xf32>, vector<1x4xf32> -> vector<1x4xf32>
    "tpu.trace_stop"() : () -> ()
    %c0_6 = arith.constant 0 : index
    %c0_7 = arith.constant 0 : index
    %6 = vector.load %arg3[%c0_6, %c0_7] : memref<1x4xf32, #tpu.memory_space<vmem>>, vector<1x4xf32>
    %7 = arith.addf %5, %6 : vector<1x4xf32>
    %cst_8 = arith.constant 0.000000e+00 : f32
    %8 = vector.broadcast %cst_8 : f32 to vector<1x4xf32>
    %9 = arith.maximumf %7, %8 : vector<1x4xf32>
    %c0_9 = arith.constant 0 : index
    %c0_10 = arith.constant 0 : index
    %10 = vector.load %arg4[%c0_9, %c0_10] : memref<16x4xf32, #tpu.memory_space<vmem>>, vector<16x4xf32>
    "tpu.trace_start"() <{level = 10 : i32, message = "nh,ch->nc"}> : () -> ()
    %cst_11 = arith.constant dense<0.000000e+00> : vector<1x16xf32>
    %11 = tpu.matmul %9, %10, %cst_11 {dimension_numbers = #tpu.dot_dimension_numbers<[1], [1], [0], [0], [0, 0, 1, 0], [], []>} : vector<1x4xf32>, vector<16x4xf32>, vector<1x16xf32> -> vector<1x16xf32>
    "tpu.trace_stop"() : () -> ()
    %c0_12 = arith.constant 0 : index
    %c0_13 = arith.constant 0 : index
    %12 = vector.load %arg5[%c0_12, %c0_13] : memref<1x16xf32, #tpu.memory_space<vmem>>, vector<1x16xf32>
    %13 = arith.addf %11, %12 : vector<1x16xf32>
    %14 = arith.negf %13 : vector<1x16xf32>
    %15 = math.exp %14 : vector<1x16xf32>
    %cst_14 = arith.constant 1.000000e+00 : f32
    %16 = vector.broadcast %cst_14 : f32 to vector<1x16xf32>
    %17 = arith.addf %16, %15 : vector<1x16xf32>
    %18 = arith.divf %16, %17 : vector<1x16xf32>
    %c0_15 = arith.constant 0 : index
    %c0_16 = arith.constant 0 : index
    %19 = vector.load %arg6[%c0_15, %c0_16] : memref<1x16xf32, #tpu.memory_space<vmem>>, vector<1x16xf32>
    %20 = vector.shape_cast %19 : vector<1x16xf32> to vector<1x1x16xf32>
    "tpu.trace_start"() <{level = 10 : i32, message = "nxc,nck->nxk"}> : () -> ()
    %cst_17 = arith.constant dense<0.000000e+00> : vector<1x1x256xf32>
    %21 = tpu.matmul %20, %0, %cst_17 {dimension_numbers = #tpu.dot_dimension_numbers<[2], [1], [1], [2], [0, 0, 0, 1, 1, 2], [0], [0]>} : vector<1x1x16xf32>, vector<1x16x256xf32>, vector<1x1x256xf32> -> vector<1x1x256xf32>
    "tpu.trace_stop"() : () -> ()
    %c0_18 = arith.constant 0 : index
    %22 = memref.load %arg7[%c0_18] : memref<1xf32, #tpu.memory_space<smem>>
    %23 = vector.broadcast %22 : f32 to vector<1x1x256xf32>
    %24 = arith.addf %21, %23 : vector<1x1x256xf32>
    %25 = arith.negf %24 : vector<1x1x256xf32>
    %26 = math.exp %25 : vector<1x1x256xf32>
    %cst_19 = arith.constant 1.000000e+00 : f32
    %27 = vector.broadcast %cst_19 : f32 to vector<1x1x256xf32>
    %28 = arith.addf %27, %26 : vector<1x1x256xf32>
    %29 = arith.divf %27, %28 : vector<1x1x256xf32>
    %30 = vector.shape_cast %18 : vector<1x16xf32> to vector<1x16x1xf32>
    %31 = vector.broadcast %30 : vector<1x16x1xf32> to vector<1x16x256xf32>
    %32 = vector.broadcast %29 : vector<1x1x256xf32> to vector<1x16x256xf32>
    %33 = arith.addf %31, %32 : vector<1x16x256xf32>
    %34 = arith.mulf %0, %33 : vector<1x16x256xf32>
    %c0_20 = arith.constant 0 : index
    %c0_21 = arith.constant 0 : index
    %c0_22 = arith.constant 0 : index
    %35 = vector.load %arg8[%c0_20, %c0_21, %c0_22] : memref<1x16x256xf32, #tpu.memory_space<vmem>>, vector<1x16x256xf32>
    tpu.vector_store %arg8[%c0_20, %c0_21, %c0_22], %34 {strides = array<i32>} : memref<1x16x256xf32, #tpu.memory_space<vmem>>, vector<1x16x256xf32>,
    return
  }
  func.func @transform_0(%arg0: i32) -> (i32, i32, i32) {
    %c0_i32 = arith.constant 0 : i32
    %c0_i32_0 = arith.constant 0 : i32
    %c0_i32_1 = arith.constant 0 : i32
    return %arg0, %c0_i32, %c0_i32_0 : i32, i32, i32
  }
  func.func @transform_1(%arg0: i32) -> (i32, i32) {
    %c0_i32 = arith.constant 0 : i32
    %c0_i32_0 = arith.constant 0 : i32
    %c0_i32_1 = arith.constant 0 : i32
    return %c0_i32, %c0_i32_0 : i32, i32
  }
  func.func @transform_2(%arg0: i32) -> (i32, i32) {
    %c0_i32 = arith.constant 0 : i32
    %c0_i32_0 = arith.constant 0 : i32
    %c0_i32_1 = arith.constant 0 : i32
    return %c0_i32, %c0_i32_0 : i32, i32
  }
  func.func @transform_3(%arg0: i32) -> (i32, i32) {
    %c0_i32 = arith.constant 0 : i32
    %c0_i32_0 = arith.constant 0 : i32
    %c0_i32_1 = arith.constant 0 : i32
    return %c0_i32, %c0_i32_0 : i32, i32
  }
  func.func @transform_4(%arg0: i32) -> (i32, i32) {
    %c0_i32 = arith.constant 0 : i32
    %c0_i32_0 = arith.constant 0 : i32
    %c0_i32_1 = arith.constant 0 : i32
    return %c0_i32, %c0_i32_0 : i32, i32
  }
  func.func @transform_5(%arg0: i32) -> (i32, i32) {
    %c0_i32 = arith.constant 0 : i32
    %c0_i32_0 = arith.constant 0 : i32
    %c0_i32_1 = arith.constant 0 : i32
    return %c0_i32, %c0_i32_0 : i32, i32
  }
  func.func @transform_6(%arg0: i32) -> i32 {
    %c0_i32 = arith.constant 0 : i32
    %c0_i32_0 = arith.constant 0 : i32
    return %c0_i32 : i32
  }
  func.func @transform_7(%arg0: i32) -> (i32, i32, i32) {
    %c0_i32 = arith.constant 0 : i32
    %c0_i32_0 = arith.constant 0 : i32
    %c0_i32_1 = arith.constant 0 : i32
    return %arg0, %c0_i32, %c0_i32_0 : i32, i32, i32
  }
}

</mosaic_0001>

<bundles_post_ra>
// kernel: tpu_custom_call.1
= control target key start
LH: loop header
LB: loop body
LE: loop exit
PB: predicated region body
PF: predicated region fallthrough
CT: control target
= control target key end

     0   :  { %s1175_s0 = inlined_call_operand.hbm [shape: f32[2,16,256], index: 0, kind: input, shape index: {}]   ;;  %s1176_s1 = inlined_call_operand.vmem [shape: f32[4,16], index: 1, kind: input, shape index: {}]   ;;  %s1177_s2 = inlined_call_operand.vmem [shape: f32[1,4], index: 2, kind: input, shape index: {}]   ;;  %s1178_s3 = inlined_call_operand.vmem [shape: f32[16,4], index: 3, kind: input, shape index: {}]   ;;  %s1179_s4 = inlined_call_operand.vmem [shape: f32[1,16], index: 4, kind: input, shape index: {}]   ;;  %s1180_s5 = inlined_call_operand.vmem [shape: f32[1,16], index: 5, kind: input, shape index: {}]   ;;  %s1181_s6 = inlined_call_operand.<no memory space> [shape: f32[1], index: 6, kind: input, shape index: {}]   ;;  %s1182_s7 = inlined_call_operand.hbm [shape: f32[2,16,256], index: 7, kind: output, shape index: {}]  }
   0x1   :  { %12 = sst [smem:[#allocation2]] %s1181_s6 }
   0x2   :  { %13 = vsyncpa [#allocation4], 0 }
   0x3   :  { %15 = vsyncpa [#allocation4 + $0x1], 0 }
   0x4   :  { %16 = vsyncpa [#allocation5], 0 }
   0x5   :  { %18 = vsyncpa [#allocation5 + $0x1], 0  ;;  %s965_s26 = smov 0   ;;  %s967_s27 = smov 0  }
   0x6   :  { %s969_s28 = smov 0   ;;  %s971_s29 = smov 0  }
   0x7 LB: > { %s986_s6 = sadd.s32 4294967295, %s911_s29   ;;  %s700_s30 = sadd.s32 4294967294, %s911_s29   ;;  %s911_s29 = sphi %s971_s29, %s1195_s29   ;;  %s907_s28 = sphi %s969_s28, %s1194_s28   ;;  %s903_s27 = sphi %s967_s27, %s1193_s27   ;;  %s899_s26 = sphi %s965_s26, %s1192_s26  }
   0x8   : > { %s990_s8 = sadd.s32 1, %s911_s29   ;;  %s31_s9 = sadd.s32 1, %s907_s28 }
   0x9   : > { %s28_s10 = ssub.s32 %s911_s29, %s990_s8  ;;  %p38_p0 = scmp.ne.s32.totalorder %s907_s28, %s903_s27 }
   0xa   : > { %p29_p1 = scmp.eq.s32.totalorder %s28_s10, 0  ;;  %p39_p2 = scmp.eq.s32.totalorder %s911_s29, 0 }
   0xb   : > { %p44_p3 = scmp.ne.s32.totalorder %s903_s27, %s899_s26  ;;  %p45_p4 = scmp.eq.s32.totalorder %s986_s6, 0 }
   0xc   : > { %s1002_s11 = scalar_select %p29_p1, %s907_s28, %s31_s9  }
   0xd   : > { %p1004_p5 = por %p39_p2, %p38_p0  ;;  %p1008_p6 = por %p45_p4, %p44_p3 }
   0xe   : > { %p194_p7 = scmp.eq.s32.totalorder %s986_s6, 1  ;;  %p200_p8 = scmp.eq.s32.totalorder %s700_s30, 1 }
   0xf   : > { %p762_p10 = scmp.lt.s32.totalorder %s911_s29, 2  ;;  %s238_s16 = sand.u32 1, %s907_s28  }
  0x10   : > { %p1015_p11 = por %p194_p7, %p38_p0  ;;  %p1019_p12 = por %p200_p8, %p44_p3 }
  0x11   : > { %s723_s17 = sshll.u32 %s911_s29, 9  ;;  %s703_s18 = sshll.u32 %s238_s16, 5 }
  0x12   : > { %s1186_s14 = scalar_select %p1015_p11, 1, 0 }
  0x13   : > { %s1187_s15 = scalar_select %p1019_p12, 1, 0 }
  0x14   : > { %s1028_s21 = scalar_lea.hbm %s1175_s0, %s723_s17  ;;  %s242_s22 = scalar_lea.vmem [#allocation3], %s703_s18 }
  0x15   : > { %s249_s23 = sshll.u32 %s242_s22, 4  ;;  %p1032_p13 = pnand %p762_p10, %p1004_p5  ;;  %s1036_s23 = int_to_ptr.vmem [resolvable:$true] %s249_s23 }
  0x16   : > { %s1038_s25 = scalar_lea.sflag [#allocation4], %s238_s16  ;;  %s815_s30 = scalar_lea.hbm %s1028_s21, 512 }
  0x17   : > { %p816_p0 = scmp.ne.s32.totalorder %s1028_s21, %s815_s30  ;;  %p817_p1 = pneg %p1032_p13 }
  0x18   : > { %s820_s12 = scalar_lea.hbm %s1175_s0, 1024  ;;  %p821_p4 = scmp.lt.u32.totalorder %s1028_s21, %s1175_s0 }
  0x19   : > { %p818_p2 = pnand %p817_p1, %p816_p0  ;;  %p822_p5 = scmp.lt.u32.totalorder %s820_s12, %s815_s30 }
  0x1a   : > { %p824_p8 = scmp.lt.u32.totalorder %s815_s30, %s1028_s21 }
  0x1b   : > { %p819_p3 = pneg %p818_p2  ;;  %p823_p7 = por %p822_p5, %p821_p4 }
  0x1d   : > { %p825_p10 = por %p824_p8, %p823_p7 }
  0x1f   : > { %p826_p9 = pnand %p825_p10, %p819_p3 }
  0x21   : > { %829 = shalt.err (!%p826_p9)
}
  0x22   : > { %s830_s16 = scalar_lea.vmem %s1036_s23, 512  ;;  %s913_s19 = smov [#allocation3]  }
  0x23   : > { %p831_p0 = scmp.ne.s32.totalorder %s1036_s23, %s830_s16  ;;  %s835_s20 = sshll.u32 %s913_s19, 4  ;;  %s836_s20 = int_to_ptr.vmem [resolvable:$false] %s835_s20 }
  0x24   : > { %s837_s22 = scalar_lea.vmem %s836_s20, 1024  ;;  %p838_p11 = scmp.lt.s32.totalorder %s1036_s23, %s836_s20 }
  0x25   : > { %p833_p2 = pnand %p831_p0, %p817_p1  ;;  %p839_p4 = scmp.lt.s32.totalorder %s837_s22, %s830_s16 }
  0x27   : > { %p834_p12 = pneg %p833_p2  ;;  %p840_p5 = por %p839_p4, %p838_p11 }
  0x29   : > { %p841_p7 = pnand %p840_p5, %p834_p12 }
  0x2b   : > { %844 = shalt.err (!%p841_p7)
}
  0x2c   : > { %s914_s30 = smov 256   ;;  %s915_s9 = smov 16  }
  0x2d   : > { %757 = dma.hbm_to_vmem [thread:$0]  (!%p1032_p13), %s1028_s21, 512, %s1036_s23, %s1038_s25, %s914_s30, %s914_s30, %s915_s9  }
  0x2e   : > { %p706_p9 = scmp.ge.s32.totalorder %s911_s29, 1  ;;  %p257_p1 = scmp.lt.s32.totalorder %s911_s29, 3 }
  0x30   : > { %p258_p3 = pnand %p706_p9, %p257_p1 }
  0x31   : > { %s1069_s10 = sand.u32 (!%p258_p3), 1, %s903_s27  }
  0x32   : > { %261 = sbr.rel (%p258_p3) target bundleno = 808 (0x328), region = 48  ;;  %s707_s12 = sshll.u32 (!%p258_p3), %s1069_s10, 5 }
  0x33   : > { %s264_s17 = scalar_lea.sflag (!%p258_p3), [#allocation4], %s1069_s10  ;;  %s267_s18 = scalar_lea.vmem (!%p258_p3), [#allocation3], %s707_s12 }
  0x39   : > { %890 = dma.done.wait (%p1008_p6), %s264_s17, 512  }
  0x3a   : > { %892 = vsyncadd (%p1008_p6), %s264_s17, 4294966784  ;;  %v1079_v0 = vld [vmem:[%s267_s18] sm:$0xff]  ;;  %v1081_v1 = vld [vmem:[%s267_s18 + $0x8] sm:$0xff]  ;;  %v916_v6 = vmov 0.0   ;;  %vm327_vm0 = vcmask 130048   ;;  %vm917_vm1 = vmmov 0   ;;  %v314_v12 = vlaneseq }
  0x3b   : > { %v1083_v2 = vld [vmem:[%s267_s18 + $0x10] sm:$0xff]  ;;  %v302_v3 = vadd.f32 %v1081_v1, %v1079_v0  ;;  %v1087_v4 = vld [vmem:[%s267_s18 + $0x18] sm:$0xff]  ;;  %730 = vmatprep.subr.mxu0 %v916_v6  ;;  %v310_v7 = vld [vmem:[%s1176_s1] sm:$0xf]  ;;  %732 = vmatprep.mubr.msk.f32.mxu0 %vm917_vm1, %v916_v6  ;;  %vm407_vm2 = vcmask 31744   ;;  %v918_v10 = vmov 0.0|0.0  }
  0x3c   : > { %v305_v5 = vadd.f32 %v1087_v4, %v1083_v2  ;;  %731 = vmatpush3.xpose.msk.msra.mxu0 %vm327_vm0, %v310_v7  ;;  %739 = vmatprep.mubr.msk.f32.mxu1 %vm917_vm1, %v916_v6  ;;  %v404_v8 = vld [vmem:[%s1178_s3] sm:$0xff]  ;;  %v405_v9 = vld [vmem:[%s1178_s3 + $0x8] sm:$0xff]  ;;  %vm744_vm3 = vmpackc.low %vm407_vm2, %vm407_vm2  ;;  %v315_v13 = vand.u32 127, %v314_v12  ;;  %v317_v14 = vshrl.u32 %v314_v12, 7  ;;  %vm325_vm4 = vcmask 130112   ;;  %s494_s9 = sld [smem:[#allocation2]] }
  0x3d   : > { %303 = vadd.xlane.f32.xlu0 %v302_v3  ;;  %742 = vmatprep.subr.bf16.mxu1 %v918_v10  ;;  %v743_v11 = vpack.c.bf16 %v405_v9, %v404_v8  ;;  %v748_v25 = vpack.c.bf16 %v1083_v2, %v1079_v0  ;;  %v746_v26 = vpack.c.bf16 %v1087_v4, %v1081_v1  ;;  %v493_v27 = vld [vmem:[%s1180_s5] sm:$0x1]  ;;  %s297_s13 = scalar_lea.vmem [#allocation6], %s707_s12  ;;  %s724_s23 = sshll.u32 %s986_s6, 9 }
  0x3e   : > { %v320_v15 = vadd.s32 4294967288, %v315_v13  ;;  %v318_v17 = vsub.s32 %v315_v13, %v317_v14  ;;  %v311_v28 = vld [vmem:[%s1177_s2] sm:$0x1]  ;;  %v584_v51 = vsub.s32 0, %v317_v14  ;;  %s627_s21 = sshll.u32 %s297_s13, 4  ;;  %s1129_s25 = scalar_lea.hbm %s1182_s7, %s724_s23  ;;  %s1124_s21 = int_to_ptr.vmem [resolvable:$true] %s627_s21 }
  0x3f   : > { %745 = vmatpush3.bf16.xpose.msk.msra.mxu1 %vm744_vm3, %v743_v11  ;;  %747 = vmatprep.subr.bf16.mxu0 %v746_v26  ;;  %v406_v42 = vld [vmem:[%s1179_s4] sm:$0x1]  ;;  %s614_s6 = scalar_lea.sflag [#allocation5], %s1069_s10  ;;  %s845_s16 = scalar_lea.vmem %s1124_s21, 512 }
  0x40   : > { %v323_v19 = vsub.s32 %v320_v15, %v317_v14  ;;  %p846_p6 = scmp.ne.s32.totalorder %s1124_s21, %s845_s16  ;;  %p1189_p11 = scmp.ne.s32.totalorder %s1186_s14, 0 }
  0x41   : > { %306 = vadd.xlane.f32.xlu0 %v305_v5  ;;  %s919_s19 = smov [#allocation6]  }
  0x42   : > { %v495_v35 = vstv %s494_s9  ;;  %p847_p12 = pnand %p846_p6, %p1189_p11  ;;  %s849_s20 = sshll.u32 %s919_s19, 4  ;;  %s850_s20 = int_to_ptr.vmem [resolvable:$false] %s849_s20 }
  0x43   : > { %s851_s22 = scalar_lea.vmem %s850_s20, 1024  ;;  %p852_p8 = scmp.lt.s32.totalorder %s1124_s21, %s850_s20 }
  0x44   : > { %p848_p13 = pneg %p847_p12  ;;  %p853_p10 = scmp.lt.s32.totalorder %s851_s22, %s845_s16 }
  0x46   : > { %p854_p0 = por %p853_p10, %p852_p8 }
  0x48   : > { %p855_p2 = pnand %p854_p0, %p848_p13 }
  0xca   : > { %v304_v16 = vpop.xlane.xlu0 %303 }
  0xcb   : > { %v308_v18 = vmul.f32 0.00390625, %v304_v16 }
  0xcd   : > { %v319_v22 = vrot.slane %v308_v18, %v318_v17 }
  0xce   : > { %v307_v20 = vpop.xlane.xlu0 %306 }
  0xcf   : > { %v309_v21 = vmul.f32 0.00390625, %v307_v20 }
  0xd1   : > { %v324_v23 = vrot.slane %v309_v21, %v323_v19 }
  0xd3   : > { %v326_v24 = vsel %vm325_vm4, %v324_v23, %v319_v22 }
  0xd4   : > { %733 = vmatmul.mubr.msk.f32.vlgmr.msra.gmra.mrb[0].mxu0 %vm327_vm0, %v326_v24 }
  0xd5   : > { %563 = vmatprep.mubr.f32.mxu0 %v916_v6  ;;  %749 = vmatpush1.bf16.msra.mxu0 %v748_v25 }
  0xd8   : > { %715 = vmatmul.mubr.msk.f32.vlgmr.msra.gmra.mrb[2].mxu0 %vm327_vm0, %v493_v27 }
 0x1a7   : > { %v399_v29 = vpop.f32.mrb[0].mxu0 }
 0x1a8   : > { %v400_v30 = vadd.f32 %v399_v29, %v311_v28  ;;  %v734_v31 = vpop.f32.mrb[1].mxu0 }
 0x1aa   : > { %v403_v32 = vmax.f32 %v400_v30, 0.0 }
 0x1ab   : > { %v565_v33 = vpop.f32.mrb[2].mxu0 }
 0x1ac   : > { %740 = vmatmul.mubr.msk.f32.vlgmr.msra.gmra.mrb[0].mxu1 %vm407_vm2, %v403_v32  ;;  %v567_v34 = vpop.f32.mrb[3].mxu0  ;;  %v566_v36 = vadd.f32 %v565_v33, %v495_v35 }
 0x1ad   : > { %v568_v37 = vadd.f32 %v567_v34, %v495_v35 }
 0x1ae   : > { %v716_v38 = vmul.f32 -1.442695, %v566_v36 }
 0x1af   : > { %v717_v39 = vmul.f32 -1.442695, %v568_v37 }
 0x1b0   : > { %803 = vpow2.f32 %v716_v38 }
 0x1b1   : > { %805 = vpow2.f32 %v717_v39 }
 0x1ba   : > { %v804_v40 = vpop.eup %803 }
 0x1bb   : > { %v806_v41 = vpop.eup %805  ;;  %v576_v43 = vadd.f32 1.0, %v804_v40 }
 0x1bc   : > { %v577_v44 = vadd.f32 1.0, %v806_v41 }
 0x1bd   : > { %807 = vrcp.f32 %v576_v43 }
 0x1be   : > { %809 = vrcp.f32 %v577_v44 }
 0x1c7   : > { %v808_v49 = vpop.eup %807 }
 0x1c8   : > { %v810_v50 = vpop.eup %809  ;;  %v596_v54 = vrot.slane %v808_v49, %v584_v51 }
 0x1c9   : > { %v600_v55 = vrot.slane %v810_v50, %v584_v51 }
 0x27f   : > { %v483_v45 = vpop.f32.mrb[0].mxu1 }
 0x280   : > { %v484_v46 = vadd.f32 %v483_v45, %v406_v42  ;;  %v741_v47 = vpop.f32.mrb[1].mxu1 }
 0x282   : > { %v714_v48 = vmul.f32 -1.442695, %v484_v46 }
 0x284   : > { %811 = vpow2.f32 %v714_v48 }
 0x28e   : > { %v812_v52 = vpop.eup %811 }
 0x28f   : > { %v490_v53 = vadd.f32 1.0, %v812_v52 }
 0x291   : > { %813 = vrcp.f32 %v490_v53 }
 0x29b   : > { %v814_v56 = vpop.eup %813 }
 0x29c   : > { %v585_v57 = vrot.slane %v814_v56, %v584_v51 }
 0x29e   : > { %587 = vbcast.lane.b32.xlu1 %v585_v57, 256 }
 0x2a2   : > { %591 = vbcast.lane.b32.xlu1 %v585_v57, 264 }
 0x310   : > { %v588_v58 = vpop.permute.xlu1 %587 }
 0x311   : > { %v601_v59 = vadd.f32 %v596_v54, %v588_v58  ;;  %v602_v60 = vadd.f32 %v600_v55, %v588_v58 }
 0x313   : > { %v605_v61 = vmul.f32 %v601_v59, %v1079_v0  ;;  %v606_v62 = vmul.f32 %v602_v60, %v1081_v1 }
 0x314   : > { %v592_v63 = vpop.permute.xlu1 %591 }
 0x315   : > { %609 = vst [vmem:[%s297_s13] sm:$0xff] %v605_v61  ;;  %610 = vst [vmem:[%s297_s13 + $0x8] sm:$0xff] %v606_v62  ;;  %v603_v3 = vadd.f32 %v596_v54, %v592_v63  ;;  %v604_v5 = vadd.f32 %v600_v55, %v592_v63 }
 0x317   : > { %v607_v0 = vmul.f32 %v603_v3, %v1083_v2  ;;  %v608_v1 = vmul.f32 %v604_v5, %v1087_v4 }
 0x319   : > { %611 = vst [vmem:[%s297_s13 + $0x10] sm:$0xff] %v607_v0  ;;  %612 = vst [vmem:[%s297_s13 + $0x18] sm:$0xff] %v608_v1 }
 0x31a   : > { %858 = shalt.err (!%p855_p2)
}
 0x31b   : > { %s859_s30 = scalar_lea.hbm %s1129_s25, 512  ;;  %s863_s18 = scalar_lea.hbm %s1182_s7, 1024 }
 0x31c   : > { %p860_p4 = scmp.ne.s32.totalorder %s1129_s25, %s859_s30  ;;  %p864_p9 = scmp.lt.u32.totalorder %s1129_s25, %s1182_s7 }
 0x31d   : > { %p865_p1 = scmp.lt.u32.totalorder %s863_s18, %s859_s30  ;;  %p867_p6 = scmp.lt.u32.totalorder %s859_s30, %s1129_s25 }
 0x31e   : > { %p861_p5 = pnand %p860_p4, %p1189_p11 }
 0x31f   : > { %p866_p3 = por %p865_p1, %p864_p9 }
 0x320   : > { %p862_p7 = pneg %p861_p5 }
 0x321   : > { %p868_p12 = por %p867_p6, %p866_p3 }
 0x323   : > { %p869_p13 = pnand %p868_p12, %p862_p7 }
 0x325   : > { %872 = shalt.err (!%p869_p13)
}
 0x326   : > { %s920_s24 = smov 256   ;;  %s921_s12 = smov 16  }
 0x327   : > { %752 = dma.vmem_to_hbm [thread:$0]  (%p1189_p11), %s1124_s21, 512, %s1129_s25, %s614_s6, %s920_s24, %s920_s24, %s921_s12  }
 0x328 PF: > { %s642_s16 = sand.u32 1, %s899_s26   ;;  %p1190_p8 = scmp.ne.s32.totalorder %s1187_s15, 0 }
 0x329   : > { %p1191_p10 = scmp.ge.s32.totalorder %s911_s29, 2  ;;  %s643_s19 = scalar_lea.sflag [#allocation5], %s642_s16 }
 0x32b   : > { %p759_p0 = pnand %p1191_p10, %p1190_p8 }
 0x32d   : > { %894 = dma.done.wait (!%p759_p0), %s643_s19, 512  }
 0x32e   : > { %896 = vsyncadd (!%p759_p0), %s643_s19, 4294966784  ;;  %p21_p2 = scmp.ge.s32.totalorder %s990_s8, 4   ;;  %s1192_s26 = smov %s903_s27 }
 0x32f   : > { %s1193_s27 = smov %s907_s28  ;;  %s1194_s28 = smov %s1002_s11 }
 0x330   : > { %s1195_s29 = smov %s990_s8  ;;  %23 = sbr.rel (!%p21_p2) target bundleno = 7 (0x7), region = 93 }
 0x337   :  { %648 = vsyncpa [#allocation4], 1 }
 0x338   :  { %650 = vsyncpa [#allocation4 + $0x1], 1 }
 0x339   :  { %651 = vsyncpa [#allocation5], 1 }
 0x33a   :  { %653 = vsyncpa [#allocation5 + $0x1], 1 }

</bundles_post_ra>
